<compile_context>
chip_gen: v7x
topology: tpu7x:2x2x1
jax: 0.10.0
libtpu: 0.0.40
codegen_flags: <defaults>
</compile_context>

<pallas_src>
import functools

import jax
import jax.numpy as jnp
from jax.experimental import pallas as pl
from jax.experimental.pallas import tpu as pltpu

LEAKY_SLOPE = 0.01   # F.leaky_relu default
LN_EPS = 1e-5        # nn.LayerNorm default


def _leaky_relu(x):
    return jnp.where(x >= 0, x, LEAKY_SLOPE * x)


# ---------------------------------------------------------------------------
# Kernel
# ---------------------------------------------------------------------------
def _per_head_layernorm(h, f, left, gamma, beta):
    """LayerNorm over each head's own F features of a fused (B, 2F) activation.

    `left` is the precomputed lane mask (lanes < F == head 1).  Right-head
    statistics are derived as total-minus-left; variance is the stable
    two-pass (x - mean)^2 form; rsqrt only touches (B, 1) per-head scalars.
    """
    inv_f = 1.0 / f
    hl = jnp.where(left, h, 0.0)
    s_l = jnp.sum(hl, axis=-1, keepdims=True)          # (B, 1)
    s_t = jnp.sum(h, axis=-1, keepdims=True)
    m_l = s_l * inv_f
    m_r = (s_t - s_l) * inv_f
    mean = jnp.where(left, m_l, m_r)                    # broadcast via mask
    d = h - mean
    d2 = d * d
    d2l = jnp.where(left, d2, 0.0)
    sd2_l = jnp.sum(d2l, axis=-1, keepdims=True)
    sd2_t = jnp.sum(d2, axis=-1, keepdims=True)
    v_l = sd2_l * inv_f
    v_r = (sd2_t - sd2_l) * inv_f
    inv = jnp.where(left, jax.lax.rsqrt(v_l + LN_EPS), jax.lax.rsqrt(v_r + LN_EPS))
    return d * inv * gamma + beta


def _critic_kernel(layer_norm, f1, f2,
                   state_ref, action_ref,
                   w1s_ref, w1a_ref, v1_ref,
                   w2_ref, v2_ref,
                   wf_t_ref, bf_t_ref,
                   out_ref):
    # ---- fused layer 1: state @ W1s + action @ W1a + b ->  (bb, 2*F1) -------
    h = (jnp.dot(state_ref[...], w1s_ref[...], preferred_element_type=jnp.float32)
         + jnp.dot(action_ref[...], w1a_ref[...], preferred_element_type=jnp.float32)
         + v1_ref[0:1, :])

    if layer_norm:
        cols1 = jax.lax.broadcasted_iota(jnp.int32, h.shape, 1)
        left1 = cols1 < f1                              # built once, reused
        h = _per_head_layernorm(h, f1, left1, v1_ref[1:2, :], v1_ref[2:3, :])
    h = _leaky_relu(h)

    # ---- fused layer 2 (block-diagonal): (bb, 2*F1) -> (bb, 2*F2) -----------
    h = jnp.dot(h, w2_ref[...], preferred_element_type=jnp.float32) + v2_ref[0:1, :]
    if layer_norm:
        if f1 == f2:
            left2 = left1
        else:
            cols2 = jax.lax.broadcasted_iota(jnp.int32, h.shape, 1)
            left2 = cols2 < f2
        h = _per_head_layernorm(h, f2, left2, v2_ref[1:2, :], v2_ref[2:3, :])
    h = _leaky_relu(h)

    # ---- fused final layer, emitted lane-dense as (2, bb) -------------------
    # wf_t is (2, 2*F2); contract both operands on the feature axis so the
    # result is produced directly in (head, batch) layout — no transpose, no
    # masked 2-lane stores.
    q = jax.lax.dot_general(wf_t_ref[...], h, (((1,), (1,)), ((), ())),
                            preferred_element_type=jnp.float32)
    out_ref[...] = q + bf_t_ref[...]                    # bf_t is (2, 1)


# ---------------------------------------------------------------------------
# Parameter construction / packing
# ---------------------------------------------------------------------------
def init_critic_params(key, state_dim, n_actions, full1_dim, full2_dim):
    """Synthetic per-layer params mirroring the PyTorch module.
    Linear weights are stored transposed as [in, out]."""
    in_dim = state_dim + n_actions
    keys = jax.random.split(key, 12)

    def kaiming_uniform(k, fan_in, shape):
        gain = jnp.sqrt(2.0 / (1.0 + LEAKY_SLOPE ** 2))
        bound = gain * jnp.sqrt(3.0 / fan_in)
        return jax.random.uniform(k, shape, jnp.float32, -bound, bound)

    def linear(kw, kb, fan_in, fan_out):
        w = kaiming_uniform(kw, fan_in, (fan_in, fan_out))
        bb = 1.0 / jnp.sqrt(fan_in)
        b = jax.random.uniform(kb, (1, fan_out), jnp.float32, -bb, bb)
        return w, b

    w1, b1 = linear(keys[0], keys[1], in_dim, full1_dim)
    w2, b2 = linear(keys[2], keys[3], full1_dim, full2_dim)
    wf1, bf1 = linear(keys[4], keys[5], full2_dim, 1)
    w3, b3 = linear(keys[6], keys[7], in_dim, full1_dim)
    w4, b4 = linear(keys[8], keys[9], full1_dim, full2_dim)
    wf2, bf2 = linear(keys[10], keys[11], full2_dim, 1)

    ones = lambda d: jnp.ones((1, d), jnp.float32)
    zeros = lambda d: jnp.zeros((1, d), jnp.float32)

    return dict(
        w1=w1, b1=b1, g1=ones(full1_dim), be1=zeros(full1_dim),
        w2=w2, b2=b2, g2=ones(full2_dim), be2=zeros(full2_dim),
        wf1=wf1, bf1=bf1,
        w3=w3, b3=b3, g3=ones(full1_dim), be3=zeros(full1_dim),
        w4=w4, b4=b4, g4=ones(full2_dim), be4=zeros(full2_dim),
        wf2=wf2, bf2=bf2,
    )


def pack_critic_params(p, state_dim):
    """Fuse the two heads into 3 f32 weight matrices + 2 packed vector tables.
    Layer-1 weights are split into state / action row blocks so the wrapper
    never has to concatenate [state, action]."""
    f1 = p["w1"].shape[1]
    f2 = p["w2"].shape[1]
    # Block-diag head fusion only pays while the fused width fits one lane
    # tile; beyond that the zero blocks would double MXU work / weight bytes.
    assert 2 * f1 <= 128 and 2 * f2 <= 128, (
        "un-fuse the heads (two dots or a size-2 head grid axis) for F >= 64")

    # layer 1: concat heads along output axis, split rows into state/action.
    w1 = jnp.concatenate([p["w1"], p["w3"]], axis=1)          # (in, 2*F1)
    w1s = w1[:state_dim, :]
    w1a = w1[state_dim:, :]
    v1 = jnp.concatenate([
        jnp.concatenate([p["b1"], p["b3"]], axis=1),
        jnp.concatenate([p["g1"], p["g3"]], axis=1),
        jnp.concatenate([p["be1"], p["be3"]], axis=1),
    ], axis=0).astype(jnp.float32)                            # (3, 2*F1)

    # layer 2: block diagonal so head-1 features only feed head-1.
    z = jnp.zeros((f1, f2), jnp.float32)
    w2 = jnp.block([[p["w2"], z], [z, p["w4"]]])              # (2*F1, 2*F2)
    v2 = jnp.concatenate([
        jnp.concatenate([p["b2"], p["b4"]], axis=1),
        jnp.concatenate([p["g2"], p["g4"]], axis=1),
        jnp.concatenate([p["be2"], p["be4"]], axis=1),
    ], axis=0).astype(jnp.float32)                            # (3, 2*F2)

    # final layer: block diagonal, stored transposed for lane-dense output.
    zf = jnp.zeros((f2, 1), jnp.float32)
    wf = jnp.block([[p["wf1"], zf], [zf, p["wf2"]]])          # (2*F2, 2)
    wf_t = wf.T                                               # (2, 2*F2)
    bf_t = jnp.concatenate([p["bf1"], p["bf2"]], axis=0)      # (2, 1)

    return dict(w1s=w1s, w1a=w1a, v1=v1, w2=w2, v2=v2,
                wf_t=wf_t, bf_t=bf_t, f1=f1, f2=f2)


# ---------------------------------------------------------------------------
# Forward wrapper
# ---------------------------------------------------------------------------
def _pick_block_b(batch):
    """Single full-extent block up to 4K rows (per-step overhead dominates);
    split into 128-multiple blocks beyond that so v7x's 2 TCs can shard."""
    if batch <= 4096:
        return batch
    for cand in (4096, 2048, 1024, 512, 256, 128):
        if batch % cand == 0:
            return cand
    return batch     # ragged large batch: fall back to one full-extent block


def critic_forward(state, action, fused, layer_norm=True):
    state = state.astype(jnp.float32)
    action = action.astype(jnp.float32)
    batch, state_dim = state.shape
    n_actions = action.shape[1]
    w1s, w1a, v1 = fused["w1s"], fused["w1a"], fused["v1"]
    w2, v2, wf_t, bf_t = fused["w2"], fused["v2"], fused["wf_t"], fused["bf_t"]
    f1, f2 = fused["f1"], fused["f2"]

    block_b = _pick_block_b(batch)
    num_blocks = batch // block_b if batch % block_b == 0 else 1
    if num_blocks == 1:
        block_b = batch

    in_specs = [
        pl.BlockSpec((block_b, state_dim), lambda i: (i, 0)),   # batch-tiled
        pl.BlockSpec((block_b, n_actions), lambda i: (i, 0)),   # batch-tiled
        pl.BlockSpec(w1s.shape, lambda i: (0, 0)),              # weights resident
        pl.BlockSpec(w1a.shape, lambda i: (0, 0)),
        pl.BlockSpec(v1.shape, lambda i: (0, 0)),
        pl.BlockSpec(w2.shape, lambda i: (0, 0)),
        pl.BlockSpec(v2.shape, lambda i: (0, 0)),
        pl.BlockSpec(wf_t.shape, lambda i: (0, 0)),
        pl.BlockSpec(bf_t.shape, lambda i: (0, 0)),
    ]
    # Lane-dense output: (2, batch), batch on the lane axis.
    out_spec = pl.BlockSpec((2, block_b), lambda i: (0, i))
    out_shape = jax.ShapeDtypeStruct((2, batch), jnp.float32)

    args = (state, action, w1s, w1a, v1, w2, v2, wf_t, bf_t)
    bytes_accessed = sum(int(a.size) * a.dtype.itemsize for a in args) + batch * 2 * 4
    # flops exclude the zero halves of the block-diagonal matmuls.
    cost = pl.CostEstimate(
        flops=2 * batch * ((state_dim + n_actions) * 2 * f1 + 2 * f1 * f2 + 2 * f2),
        transcendentals=(4 * batch) if layer_norm else 0,
        bytes_accessed=bytes_accessed,
    )

    kernel = functools.partial(_critic_kernel, layer_norm, f1, f2)
    out = pl.pallas_call(
        kernel,
        out_shape=out_shape,
        grid=(num_blocks,),
        in_specs=in_specs,
        out_specs=out_spec,
        compiler_params=pltpu.CompilerParams(
            dimension_semantics=("parallel",)),     # shards batch blocks on v7x
        cost_estimate=cost,
    )(*args)

    q1 = out[0:1, :].T                               # (batch, 1)
    q2 = out[1:2, :].T
    return q1, q2


# ---------------------------------------------------------------------------
# Pure-JAX reference (module semantics, per-layer / unfused, f32)
# ---------------------------------------------------------------------------
def _layernorm_ref(x, gamma, beta):
    mean = jnp.mean(x, axis=-1, keepdims=True)
    var = jnp.mean((x - mean) ** 2, axis=-1, keepdims=True)
    return (x - mean) * jax.lax.rsqrt(var + LN_EPS) * gamma + beta


def _reference_forward(state, action, p, layer_norm=True):
    sa = jnp.concatenate([state, action], axis=1).astype(jnp.float32)

    def head(wa, ba, ga, bea, wb, bb, gb, beb, wf, bf):
        h = sa @ wa + ba
        if layer_norm:
            h = _layernorm_ref(h, ga, bea)
        h = _leaky_relu(h)
        h = h @ wb + bb
        if layer_norm:
            h = _layernorm_ref(h, gb, beb)
        h = _leaky_relu(h)
        return h @ wf + bf

    q1 = head(p["w1"], p["b1"], p["g1"], p["be1"],
              p["w2"], p["b2"], p["g2"], p["be2"], p["wf1"], p["bf1"])
    q2 = head(p["w3"], p["b3"], p["g3"], p["be3"],
              p["w4"], p["b4"], p["g4"], p["be4"], p["wf2"], p["bf2"])
    return q1, q2


# ---------------------------------------------------------------------------
if __name__ == "__main__":
    state_dim, n_actions = 12, 4
    full1_dim, full2_dim = 32, 32
    batch = 8

    key = jax.random.PRNGKey(0)
    k_state, k_action, k_params = jax.random.split(key, 3)

    state = jax.random.normal(k_state, (batch, state_dim), jnp.float32)
    action = jax.random.normal(k_action, (batch, n_actions), jnp.float32)
    params = init_critic_params(k_params, state_dim, n_actions,
                                full1_dim, full2_dim)
    fused = pack_critic_params(params, state_dim)

    for ln_flag in (True, False):
        q1, q2 = critic_forward(state, action, fused, layer_norm=ln_flag)
        jax.block_until_ready((q1, q2))
        r1, r2 = _reference_forward(state, action, params, layer_norm=ln_flag)
        assert q1.shape == (batch, 1) and q2.shape == (batch, 1)
        assert jnp.allclose(q1, r1, atol=2e-4, rtol=2e-4), (
            f"Q1 mismatch (layer_norm={ln_flag})")
        assert jnp.allclose(q2, r2, atol=2e-4, rtol=2e-4), (
            f"Q2 mismatch (layer_norm={ln_flag})")

    # TODO(synk): optimizer / checkpoint I/O of the original module are host-side
    # training utilities with no kernel equivalent; only forward() is implemented
    # (onlyQ1 is the Q1 lane of the same kernel output).
    print("KERNEL_OK")
</pallas_src>

<mosaic_0001>
module attributes {stable_mosaic.version = 11 : i64} {
  func.func @_critic_kernel(%arg0: i32, %arg1: memref<8x12xf32, #tpu.memory_space<vmem>>, %arg2: memref<8x4xf32, #tpu.memory_space<vmem>>, %arg3: memref<12x64xf32, #tpu.memory_space<vmem>>, %arg4: memref<4x64xf32, #tpu.memory_space<vmem>>, %arg5: memref<3x64xf32, #tpu.memory_space<vmem>>, %arg6: memref<64x64xf32, #tpu.memory_space<vmem>>, %arg7: memref<3x64xf32, #tpu.memory_space<vmem>>, %arg8: memref<2x64xf32, #tpu.memory_space<vmem>>, %arg9: memref<2x1xf32, #tpu.memory_space<vmem>>, %arg10: memref<2x8xf32, #tpu.memory_space<vmem>>) attributes {dimension_semantics = [#tpu.dimension_semantics<parallel>], iteration_bounds = array<i64: 1>, scalar_prefetch = 0 : i64, scratch_operands = 0 : i64, tpu.core_type = #tpu.core_type<tc>, window_params = [{transform_indices = @transform_0, window_bounds = array<i64: 8, 12>}, {transform_indices = @transform_1, window_bounds = array<i64: 8, 4>}, {pipeline_mode = #tpu.pipeline_mode<synchronous>, transform_indices = @transform_2, window_bounds = array<i64: 12, 64>}, {pipeline_mode = #tpu.pipeline_mode<synchronous>, transform_indices = @transform_3, window_bounds = array<i64: 4, 64>}, {pipeline_mode = #tpu.pipeline_mode<synchronous>, transform_indices = @transform_4, window_bounds = array<i64: 3, 64>}, {pipeline_mode = #tpu.pipeline_mode<synchronous>, transform_indices = @transform_5, window_bounds = array<i64: 64, 64>}, {pipeline_mode = #tpu.pipeline_mode<synchronous>, transform_indices = @transform_6, window_bounds = array<i64: 3, 64>}, {pipeline_mode = #tpu.pipeline_mode<synchronous>, transform_indices = @transform_7, window_bounds = array<i64: 2, 64>}, {pipeline_mode = #tpu.pipeline_mode<synchronous>, transform_indices = @transform_8, window_bounds = array<i64: 2, 1>}, {transform_indices = @transform_9, window_bounds = array<i64: 2, 8>}]} {
    %c0 = arith.constant 0 : index
    %c0_0 = arith.constant 0 : index
    %0 = vector.load %arg1[%c0, %c0_0] : memref<8x12xf32, #tpu.memory_space<vmem>>, vector<8x12xf32>
    %c0_1 = arith.constant 0 : index
    %c0_2 = arith.constant 0 : index
    %1 = vector.load %arg3[%c0_1, %c0_2] : memref<12x64xf32, #tpu.memory_space<vmem>>, vector<12x64xf32>
    %cst = arith.constant dense<0.000000e+00> : vector<8x64xf32>
    %2 = tpu.matmul %0, %1, %cst {dimension_numbers = #tpu.dot_dimension_numbers<[1], [0], [0], [1], [0, 0, 1, 1], [], []>} : vector<8x12xf32>, vector<12x64xf32>, vector<8x64xf32> -> vector<8x64xf32>
    %c0_3 = arith.constant 0 : index
    %c0_4 = arith.constant 0 : index
    %3 = vector.load %arg2[%c0_3, %c0_4] : memref<8x4xf32, #tpu.memory_space<vmem>>, vector<8x4xf32>
    %c0_5 = arith.constant 0 : index
    %c0_6 = arith.constant 0 : index
    %4 = vector.load %arg4[%c0_5, %c0_6] : memref<4x64xf32, #tpu.memory_space<vmem>>, vector<4x64xf32>
    %cst_7 = arith.constant dense<0.000000e+00> : vector<8x64xf32>
    %5 = tpu.matmul %3, %4, %cst_7 {dimension_numbers = #tpu.dot_dimension_numbers<[1], [0], [0], [1], [0, 0, 1, 1], [], []>} : vector<8x4xf32>, vector<4x64xf32>, vector<8x64xf32> -> vector<8x64xf32>
    %6 = arith.addf %2, %5 : vector<8x64xf32>
    %c0_8 = arith.constant 0 : index
    %c0_9 = arith.constant 0 : index
    %7 = vector.load %arg5[%c0_8, %c0_9] : memref<3x64xf32, #tpu.memory_space<vmem>>, vector<1x64xf32>
    %8 = vector.broadcast %7 : vector<1x64xf32> to vector<8x64xf32>
    %9 = arith.addf %6, %8 : vector<8x64xf32>
    %10 = tpu.iota {dimensions = array<i32: 1>} : vector<8x64xi32>
    %c32_i32 = arith.constant 32 : i32
    %11 = vector.broadcast %c32_i32 : i32 to vector<8x64xi32>
    %12 = arith.cmpi slt, %10, %11 : vector<8x64xi32>
    %c1 = arith.constant 1 : index
    %c0_10 = arith.constant 0 : index
    %13 = vector.load %arg5[%c1, %c0_10] : memref<3x64xf32, #tpu.memory_space<vmem>>, vector<1x64xf32>
    %c2 = arith.constant 2 : index
    %c0_11 = arith.constant 0 : index
    %14 = vector.load %arg5[%c2, %c0_11] : memref<3x64xf32, #tpu.memory_space<vmem>>, vector<1x64xf32>
    %cst_12 = arith.constant 0.000000e+00 : f32
    %15 = vector.broadcast %cst_12 : f32 to vector<8x64xf32>
    %16 = arith.select %12, %9, %15 : vector<8x64xi1>, vector<8x64xf32>
    %cst_13 = arith.constant dense<0.000000e+00> : vector<8xf32>
    %17 = vector.multi_reduction <add>, %16, %cst_13 [1] : vector<8x64xf32> to vector<8xf32>
    %18 = vector.shape_cast %17 : vector<8xf32> to vector<8x1xf32>
    %cst_14 = arith.constant dense<0.000000e+00> : vector<8xf32>
    %19 = vector.multi_reduction <add>, %9, %cst_14 [1] : vector<8x64xf32> to vector<8xf32>
    %20 = vector.shape_cast %19 : vector<8xf32> to vector<8x1xf32>
    %cst_15 = arith.constant 3.125000e-02 : f32
    %21 = vector.broadcast %cst_15 : f32 to vector<8x1xf32>
    %22 = arith.mulf %18, %21 : vector<8x1xf32>
    %23 = arith.subf %20, %18 : vector<8x1xf32>
    %cst_16 = arith.constant 3.125000e-02 : f32
    %24 = vector.broadcast %cst_16 : f32 to vector<8x1xf32>
    %25 = arith.mulf %23, %24 : vector<8x1xf32>
    %26 = vector.shape_cast %22 : vector<8x1xf32> to vector<8x1xf32>
    %27 = vector.broadcast %26 : vector<8x1xf32> to vector<8x64xf32>
    %28 = vector.shape_cast %25 : vector<8x1xf32> to vector<8x1xf32>
    %29 = vector.broadcast %28 : vector<8x1xf32> to vector<8x64xf32>
    %30 = arith.select %12, %27, %29 : vector<8x64xi1>, vector<8x64xf32>
    %31 = arith.subf %9, %30 : vector<8x64xf32>
    %32 = arith.mulf %31, %31 : vector<8x64xf32>
    %cst_17 = arith.constant 0.000000e+00 : f32
    %33 = vector.broadcast %cst_17 : f32 to vector<8x64xf32>
    %34 = arith.select %12, %32, %33 : vector<8x64xi1>, vector<8x64xf32>
    %cst_18 = arith.constant dense<0.000000e+00> : vector<8xf32>
    %35 = vector.multi_reduction <add>, %34, %cst_18 [1] : vector<8x64xf32> to vector<8xf32>
    %36 = vector.shape_cast %35 : vector<8xf32> to vector<8x1xf32>
    %cst_19 = arith.constant dense<0.000000e+00> : vector<8xf32>
    %37 = vector.multi_reduction <add>, %32, %cst_19 [1] : vector<8x64xf32> to vector<8xf32>
    %38 = vector.shape_cast %37 : vector<8xf32> to vector<8x1xf32>
    %cst_20 = arith.constant 3.125000e-02 : f32
    %39 = vector.broadcast %cst_20 : f32 to vector<8x1xf32>
    %40 = arith.mulf %36, %39 : vector<8x1xf32>
    %41 = arith.subf %38, %36 : vector<8x1xf32>
    %cst_21 = arith.constant 3.125000e-02 : f32
    %42 = vector.broadcast %cst_21 : f32 to vector<8x1xf32>
    %43 = arith.mulf %41, %42 : vector<8x1xf32>
    %cst_22 = arith.constant 9.99999974E-6 : f32
    %44 = vector.broadcast %cst_22 : f32 to vector<8x1xf32>
    %45 = arith.addf %40, %44 : vector<8x1xf32>
    %46 = math.rsqrt %45 : vector<8x1xf32>
    %cst_23 = arith.constant 9.99999974E-6 : f32
    %47 = vector.broadcast %cst_23 : f32 to vector<8x1xf32>
    %48 = arith.addf %43, %47 : vector<8x1xf32>
    %49 = math.rsqrt %48 : vector<8x1xf32>
    %50 = vector.shape_cast %46 : vector<8x1xf32> to vector<8x1xf32>
    %51 = vector.broadcast %50 : vector<8x1xf32> to vector<8x64xf32>
    %52 = vector.shape_cast %49 : vector<8x1xf32> to vector<8x1xf32>
    %53 = vector.broadcast %52 : vector<8x1xf32> to vector<8x64xf32>
    %54 = arith.select %12, %51, %53 : vector<8x64xi1>, vector<8x64xf32>
    %55 = arith.mulf %31, %54 : vector<8x64xf32>
    %56 = vector.broadcast %13 : vector<1x64xf32> to vector<8x64xf32>
    %57 = arith.mulf %55, %56 : vector<8x64xf32>
    %58 = vector.broadcast %14 : vector<1x64xf32> to vector<8x64xf32>
    %59 = arith.addf %57, %58 : vector<8x64xf32>
    %cst_24 = arith.constant 0.000000e+00 : f32
    %60 = vector.broadcast %cst_24 : f32 to vector<8x64xf32>
    %61 = arith.cmpf oge, %59, %60 : vector<8x64xf32>
    %cst_25 = arith.constant 0.00999999977 : f32
    %62 = vector.broadcast %cst_25 : f32 to vector<8x64xf32>
    %63 = arith.mulf %62, %59 : vector<8x64xf32>
    %64 = arith.select %61, %59, %63 : vector<8x64xi1>, vector<8x64xf32>
    %c0_26 = arith.constant 0 : index
    %c0_27 = arith.constant 0 : index
    %65 = vector.load %arg6[%c0_26, %c0_27] : memref<64x64xf32, #tpu.memory_space<vmem>>, vector<64x64xf32>
    %cst_28 = arith.constant dense<0.000000e+00> : vector<8x64xf32>
    %66 = tpu.matmul %64, %65, %cst_28 {dimension_numbers = #tpu.dot_dimension_numbers<[1], [0], [0], [1], [0, 0, 1, 1], [], []>} : vector<8x64xf32>, vector<64x64xf32>, vector<8x64xf32> -> vector<8x64xf32>
    %c0_29 = arith.constant 0 : index
    %c0_30 = arith.constant 0 : index
    %67 = vector.load %arg7[%c0_29, %c0_30] : memref<3x64xf32, #tpu.memory_space<vmem>>, vector<1x64xf32>
    %68 = vector.broadcast %67 : vector<1x64xf32> to vector<8x64xf32>
    %69 = arith.addf %66, %68 : vector<8x64xf32>
    %c1_31 = arith.constant 1 : index
    %c0_32 = arith.constant 0 : index
    %70 = vector.load %arg7[%c1_31, %c0_32] : memref<3x64xf32, #tpu.memory_space<vmem>>, vector<1x64xf32>
    %c2_33 = arith.constant 2 : index
    %c0_34 = arith.constant 0 : index
    %71 = vector.load %arg7[%c2_33, %c0_34] : memref<3x64xf32, #tpu.memory_space<vmem>>, vector<1x64xf32>
    %cst_35 = arith.constant 0.000000e+00 : f32
    %72 = vector.broadcast %cst_35 : f32 to vector<8x64xf32>
    %73 = arith.select %12, %69, %72 : vector<8x64xi1>, vector<8x64xf32>
    %cst_36 = arith.constant dense<0.000000e+00> : vector<8xf32>
    %74 = vector.multi_reduction <add>, %73, %cst_36 [1] : vector<8x64xf32> to vector<8xf32>
    %75 = vector.shape_cast %74 : vector<8xf32> to vector<8x1xf32>
    %cst_37 = arith.constant dense<0.000000e+00> : vector<8xf32>
    %76 = vector.multi_reduction <add>, %69, %cst_37 [1] : vector<8x64xf32> to vector<8xf32>
    %77 = vector.shape_cast %76 : vector<8xf32> to vector<8x1xf32>
    %cst_38 = arith.constant 3.125000e-02 : f32
    %78 = vector.broadcast %cst_38 : f32 to vector<8x1xf32>
    %79 = arith.mulf %75, %78 : vector<8x1xf32>
    %80 = arith.subf %77, %75 : vector<8x1xf32>
    %cst_39 = arith.constant 3.125000e-02 : f32
    %81 = vector.broadcast %cst_39 : f32 to vector<8x1xf32>
    %82 = arith.mulf %80, %81 : vector<8x1xf32>
    %83 = vector.shape_cast %79 : vector<8x1xf32> to vector<8x1xf32>
    %84 = vector.broadcast %83 : vector<8x1xf32> to vector<8x64xf32>
    %85 = vector.shape_cast %82 : vector<8x1xf32> to vector<8x1xf32>
    %86 = vector.broadcast %85 : vector<8x1xf32> to vector<8x64xf32>
    %87 = arith.select %12, %84, %86 : vector<8x64xi1>, vector<8x64xf32>
    %88 = arith.subf %69, %87 : vector<8x64xf32>
    %89 = arith.mulf %88, %88 : vector<8x64xf32>
    %cst_40 = arith.constant 0.000000e+00 : f32
    %90 = vector.broadcast %cst_40 : f32 to vector<8x64xf32>
    %91 = arith.select %12, %89, %90 : vector<8x64xi1>, vector<8x64xf32>
    %cst_41 = arith.constant dense<0.000000e+00> : vector<8xf32>
    %92 = vector.multi_reduction <add>, %91, %cst_41 [1] : vector<8x64xf32> to vector<8xf32>
    %93 = vector.shape_cast %92 : vector<8xf32> to vector<8x1xf32>
    %cst_42 = arith.constant dense<0.000000e+00> : vector<8xf32>
    %94 = vector.multi_reduction <add>, %89, %cst_42 [1] : vector<8x64xf32> to vector<8xf32>
    %95 = vector.shape_cast %94 : vector<8xf32> to vector<8x1xf32>
    %cst_43 = arith.constant 3.125000e-02 : f32
    %96 = vector.broadcast %cst_43 : f32 to vector<8x1xf32>
    %97 = arith.mulf %93, %96 : vector<8x1xf32>
    %98 = arith.subf %95, %93 : vector<8x1xf32>
    %cst_44 = arith.constant 3.125000e-02 : f32
    %99 = vector.broadcast %cst_44 : f32 to vector<8x1xf32>
    %100 = arith.mulf %98, %99 : vector<8x1xf32>
    %cst_45 = arith.constant 9.99999974E-6 : f32
    %101 = vector.broadcast %cst_45 : f32 to vector<8x1xf32>
    %102 = arith.addf %97, %101 : vector<8x1xf32>
    %103 = math.rsqrt %102 : vector<8x1xf32>
    %cst_46 = arith.constant 9.99999974E-6 : f32
    %104 = vector.broadcast %cst_46 : f32 to vector<8x1xf32>
    %105 = arith.addf %100, %104 : vector<8x1xf32>
    %106 = math.rsqrt %105 : vector<8x1xf32>
    %107 = vector.shape_cast %103 : vector<8x1xf32> to vector<8x1xf32>
    %108 = vector.broadcast %107 : vector<8x1xf32> to vector<8x64xf32>
    %109 = vector.shape_cast %106 : vector<8x1xf32> to vector<8x1xf32>
    %110 = vector.broadcast %109 : vector<8x1xf32> to vector<8x64xf32>
    %111 = arith.select %12, %108, %110 : vector<8x64xi1>, vector<8x64xf32>
    %112 = arith.mulf %88, %111 : vector<8x64xf32>
    %113 = vector.broadcast %70 : vector<1x64xf32> to vector<8x64xf32>
    %114 = arith.mulf %112, %113 : vector<8x64xf32>
    %115 = vector.broadcast %71 : vector<1x64xf32> to vector<8x64xf32>
    %116 = arith.addf %114, %115 : vector<8x64xf32>
    %cst_47 = arith.constant 0.000000e+00 : f32
    %117 = vector.broadcast %cst_47 : f32 to vector<8x64xf32>
    %118 = arith.cmpf oge, %116, %117 : vector<8x64xf32>
    %cst_48 = arith.constant 0.00999999977 : f32
    %119 = vector.broadcast %cst_48 : f32 to vector<8x64xf32>
    %120 = arith.mulf %119, %116 : vector<8x64xf32>
    %121 = arith.select %118, %116, %120 : vector<8x64xi1>, vector<8x64xf32>
    %c0_49 = arith.constant 0 : index
    %c0_50 = arith.constant 0 : index
    %122 = vector.load %arg8[%c0_49, %c0_50] : memref<2x64xf32, #tpu.memory_space<vmem>>, vector<2x64xf32>
    %cst_51 = arith.constant dense<0.000000e+00> : vector<2x8xf32>
    %123 = tpu.matmul %122, %121, %cst_51 {dimension_numbers = #tpu.dot_dimension_numbers<[1], [1], [0], [0], [0, 0, 1, 0], [], []>} : vector<2x64xf32>, vector<8x64xf32>, vector<2x8xf32> -> vector<2x8xf32>
    %c0_52 = arith.constant 0 : index
    %c0_53 = arith.constant 0 : index
    %124 = vector.load %arg9[%c0_52, %c0_53] : memref<2x1xf32, #tpu.memory_space<vmem>>, vector<2x1xf32>
    %125 = vector.broadcast %124 : vector<2x1xf32> to vector<2x8xf32>
    %126 = arith.addf %123, %125 : vector<2x8xf32>
    %c0_54 = arith.constant 0 : index
    %c0_55 = arith.constant 0 : index
    %127 = vector.load %arg10[%c0_54, %c0_55] : memref<2x8xf32, #tpu.memory_space<vmem>>, vector<2x8xf32>
    tpu.vector_store %arg10[%c0_54, %c0_55], %126 {strides = array<i32>} : memref<2x8xf32, #tpu.memory_space<vmem>>, vector<2x8xf32>,
    return
  }
  func.func @transform_0(%arg0: i32) -> (i32, i32) {
    %c0_i32 = arith.constant 0 : i32
    %c0_i32_0 = arith.constant 0 : i32
    return %arg0, %c0_i32 : i32, i32
  }
  func.func @transform_1(%arg0: i32) -> (i32, i32) {
    %c0_i32 = arith.constant 0 : i32
    %c0_i32_0 = arith.constant 0 : i32
    return %arg0, %c0_i32 : i32, i32
  }
  func.func @transform_2(%arg0: i32) -> (i32, i32) {
    %c0_i32 = arith.constant 0 : i32
    %c0_i32_0 = arith.constant 0 : i32
    %c0_i32_1 = arith.constant 0 : i32
    return %c0_i32, %c0_i32_0 : i32, i32
  }
  func.func @transform_3(%arg0: i32) -> (i32, i32) {
    %c0_i32 = arith.constant 0 : i32
    %c0_i32_0 = arith.constant 0 : i32
    %c0_i32_1 = arith.constant 0 : i32
    return %c0_i32, %c0_i32_0 : i32, i32
  }
  func.func @transform_4(%arg0: i32) -> (i32, i32) {
    %c0_i32 = arith.constant 0 : i32
    %c0_i32_0 = arith.constant 0 : i32
    %c0_i32_1 = arith.constant 0 : i32
    return %c0_i32, %c0_i32_0 : i32, i32
  }
  func.func @transform_5(%arg0: i32) -> (i32, i32) {
    %c0_i32 = arith.constant 0 : i32
    %c0_i32_0 = arith.constant 0 : i32
    %c0_i32_1 = arith.constant 0 : i32
    return %c0_i32, %c0_i32_0 : i32, i32
  }
  func.func @transform_6(%arg0: i32) -> (i32, i32) {
    %c0_i32 = arith.constant 0 : i32
    %c0_i32_0 = arith.constant 0 : i32
    %c0_i32_1 = arith.constant 0 : i32
    return %c0_i32, %c0_i32_0 : i32, i32
  }
  func.func @transform_7(%arg0: i32) -> (i32, i32) {
    %c0_i32 = arith.constant 0 : i32
    %c0_i32_0 = arith.constant 0 : i32
    %c0_i32_1 = arith.constant 0 : i32
    return %c0_i32, %c0_i32_0 : i32, i32
  }
  func.func @transform_8(%arg0: i32) -> (i32, i32) {
    %c0_i32 = arith.constant 0 : i32
    %c0_i32_0 = arith.constant 0 : i32
    %c0_i32_1 = arith.constant 0 : i32
    return %c0_i32, %c0_i32_0 : i32, i32
  }
  func.func @transform_9(%arg0: i32) -> (i32, i32) {
    %c0_i32 = arith.constant 0 : i32
    %c0_i32_0 = arith.constant 0 : i32
    return %c0_i32, %arg0 : i32, i32
  }
}

</mosaic_0001>

<bundles_post_ra>
// kernel: tpu_custom_call.1
= control target key start
LH: loop header
LB: loop body
LE: loop exit
PB: predicated region body
PF: predicated region fallthrough
CT: control target
= control target key end

     0   :  { %14 = vsyncpa [#allocation3], 0  ;;  %s854_s0 = inlined_call_operand.hbm [shape: f32[8,12], index: 0, kind: input, shape index: {}]   ;;  %s855_s1 = inlined_call_operand.vmem [shape: f32[8,4], index: 1, kind: input, shape index: {}]   ;;  %s856_s2 = inlined_call_operand.vmem [shape: f32[12,64], index: 2, kind: input, shape index: {}]   ;;  %s857_s3 = inlined_call_operand.vmem [shape: f32[4,64], index: 3, kind: input, shape index: {}]   ;;  %s858_s4 = inlined_call_operand.vmem [shape: f32[3,64], index: 4, kind: input, shape index: {}]   ;;  %s859_s5 = inlined_call_operand.hbm [shape: f32[64,64], index: 5, kind: input, shape index: {}]   ;;  %s860_s6 = inlined_call_operand.vmem [shape: f32[3,64], index: 6, kind: input, shape index: {}]   ;;  %s861_s7 = inlined_call_operand.vmem [shape: f32[2,64], index: 7, kind: input, shape index: {}]   ;;  %s862_s8 = inlined_call_operand.vmem [shape: f32[2,1], index: 8, kind: input, shape index: {}]   ;;  %s863_s9 = inlined_call_operand.hbm [shape: f32[2,8], index: 9, kind: output, shape index: {}]  }
   0x1   :  { %15 = vsyncpa [#allocation6], 0 }
   0x2   :  { %16 = vsyncpa [#allocation4], 0  ;;  %s676_s30 = smov [#allocation2]   ;;  %s677_s11 = smov [#allocation5]  }
   0x3   :  { %s23_s10 = sshll.u32 %s676_s30, 4  ;;  %s40_s12 = sshll.u32 %s677_s11, 4  ;;  %s24_s10 = int_to_ptr.vmem [resolvable:$true] %s23_s10  ;;  %s736_s12 = int_to_ptr.vmem [resolvable:$true] %s40_s12 }
   0x4   :  { %s604_s15 = scalar_lea.hbm %s854_s0, 128 }
   0x5   :  { %p605_p0 = scmp.ne.s32.totalorder %s854_s0, %s604_s15  ;;  %p608_p1 = scmp.lt.u32.totalorder %s604_s15, %s854_s0 }
   0x7   :  { %p610_p2 = pnand %p608_p1, %p605_p0 }
   0x9   :  { %613 = shalt.err (!%p610_p2)
}
   0xa   :  { %s614_s20 = scalar_lea.vmem %s24_s10, 128  ;;  %p619_p4 = scmp.lt.s32.totalorder %s24_s10, %s24_s10 }
   0xb   :  { %p615_p3 = scmp.ne.s32.totalorder %s24_s10, %s614_s20  ;;  %p620_p5 = scmp.lt.s32.totalorder %s614_s20, %s614_s20 }
   0xd   :  { %p621_p6 = por %p620_p5, %p619_p4 }
   0xf   :  { %p622_p7 = pnand %p621_p6, %p615_p3 }
  0x11   :  { %625 = shalt.err (!%p622_p7)
}
  0x12   :  { %26 = dma.hbm_to_vmem [thread:$0]  %s854_s0, 128, %s24_s10, [#allocation3]  }
  0x13   :  { %s626_s25 = scalar_lea.hbm %s859_s5, 1024 }
  0x14   :  { %p627_p8 = scmp.ne.s32.totalorder %s859_s5, %s626_s25  ;;  %p630_p9 = scmp.lt.u32.totalorder %s626_s25, %s859_s5 }
  0x16   :  { %p632_p10 = pnand %p630_p9, %p627_p8 }
  0x18   :  { %635 = shalt.err (!%p632_p10)
}
  0x19   :  { %s636_s30 = scalar_lea.vmem %s736_s12, 1024  ;;  %p641_p12 = scmp.lt.s32.totalorder %s736_s12, %s736_s12 }
  0x1a   :  { %p637_p11 = scmp.ne.s32.totalorder %s736_s12, %s636_s30  ;;  %p642_p13 = scmp.lt.s32.totalorder %s636_s30, %s636_s30 }
  0x1c   :  { %p643_p0 = por %p642_p13, %p641_p12 }
  0x1e   :  { %p644_p1 = pnand %p643_p0, %p637_p11 }
  0x20   :  { %647 = shalt.err (!%p644_p1)
}
  0x21   :  { %s678_s0 = smov 128   ;;  %s679_s10 = smov 8  }
  0x22   :  { %46 = dma.hbm_to_vmem [thread:$0]  %s859_s5, 1024, %s736_s12, [#allocation6], %s678_s0, %s678_s0, %s679_s10  }
  0x23   :  { %670 = dma.done.wait [#allocation3], 128  }
  0x24   :  { %671 = vsyncadd [#allocation3], 4294967168 }
  0x25   :  { %672 = dma.done.wait [#allocation6], 1024  }
  0x26   :  { %673 = vsyncadd [#allocation6], 4294966272  ;;  %v680_v0 = vmov 0.0   ;;  %vm681_vm0 = vmmov 0   ;;  %v682_v1 = vmov 0.0|0.0   ;;  %vm68_vm1 = vcmask 1043456  }
  0x27   :  { %533 = vmatprep.subr.mxu1 %v680_v0  ;;  %535 = vmatprep.mubr.msk.f32.mxu1 %vm681_vm0, %v680_v0  ;;  %vm64_vm2 = vcmask 31744   ;;  %v63_v2 = vld [vmem:[%s857_s3] sm:$0xf]  ;;  %vm683_vm3 = vmmov 1   ;;  %v61_v5 = vld [vmem:[%s856_s2 + $0x8] sm:$0xf]  ;;  %v225_v8 = vlaneseq }
  0x28   :  { %573 = vmatprep.subr.bf16.mxu0 %v682_v1  ;;  %561 = vmatprep.mubr.msk.f32.mxu0 %vm681_vm0, %v680_v0  ;;  %v62_v3 = vld [vmem:[%s855_s1] sm:$0xff]  ;;  %vm571_vm4 = vmpackc.low %vm68_vm1, %vm683_vm3  ;;  %vm142_vm5 = vcmask 97280   ;;  %vm231_vm7 = vcmask 523264   ;;  %v273_v31 = vld [vmem:[#allocation5] sm:$0xff]  ;;  %s685_s0 = smov [#allocation7]   ;;  %vm486_vm10 = vcmask 58368  }
  0x29   :  { %v60_v4 = vld [vmem:[%s856_s2] sm:$0xff]  ;;  %534 = vmatpush3.msk.msra.mxu1 %vm68_vm1, %v63_v2  ;;  %v785_v11 = vand.u32 127, %v225_v8  ;;  %v274_v32 = vld [vmem:[#allocation5 + $0x8] sm:$0xff]  ;;  %v275_v33 = vld [vmem:[#allocation5 + $0x10] sm:$0xff]  ;;  %s494_s10 = sshll.u32 %s685_s0, 4  ;;  %s495_s10 = int_to_ptr.vmem [resolvable:$true] %s494_s10 }
  0x2a   :  { %536 = vmatmul.mubr.msk.f32.vlgmr.msra.gmra.mrb[0].mxu1 %vm64_vm2, %v62_v3  ;;  %569 = vmatprep.subr.bf16.mxu1 %v682_v1  ;;  %v570_v6 = vpack.c.bf16 %v61_v5, %v60_v4  ;;  %v59_v7 = vld [vmem:[#allocation2] sm:$0xff]  ;;  %v574_v34 = vpack.c.bf16 %v274_v32, %v273_v31  ;;  %v277_v37 = vld [vmem:[#allocation5 + $0x20] sm:$0xff]  ;;  %v278_v38 = vld [vmem:[#allocation5 + $0x28] sm:$0xff]  ;;  %p653_p3 = scmp.lt.s32.totalorder %s495_s10, %s495_s10 }
  0x2b   :  { %542 = vmatprep.mubr.msk.f32.mxu1 %vm681_vm0, %v680_v0  ;;  %v508_v13 = vld [vmem:[%s858_s4] ss:$0 sm:$0xff]  ;;  %vm227_vm6 = vcmp.lt.s32.totalorder %v785_v11, 32  ;;  %v580_v39 = vpack.c.bf16 %v278_v38, %v277_v37  ;;  %v279_v40 = vld [vmem:[#allocation5 + $0x30] sm:$0xff]  ;;  %v509_v52 = vld [vmem:[%s858_s4 + $0x1] ss:$0 sm:$0xff] }
  0x2c   :  { %572 = vmatpush3.bf16.msk.msra.mxu1 %vm571_vm4, %v570_v6  ;;  %v276_v35 = vld [vmem:[#allocation5 + $0x18] sm:$0xff]  ;;  %575 = vmatpush3.bf16.msra.mxu0 %v574_v34 }
  0x2d   :  { %564 = vmatprep.subr.mxu1 %v680_v0  ;;  %v577_v36 = vpack.c.bf16 %v276_v35, %v275_v33  ;;  %576 = vmatprep.subr.bf16.mxu0 %v682_v1  ;;  %v280_v41 = vld [vmem:[#allocation5 + $0x38] sm:$0xff] }
  0x2e   :  { %v583_v42 = vpack.c.bf16 %v280_v41, %v279_v40  ;;  %v510_v55 = vld [vmem:[%s858_s4 + $0x2] ss:$0 sm:$0xff]  ;;  %v511_v60 = vld [vmem:[%s860_s6] ss:$0 sm:$0xff] }
  0x2f   :  { %543 = vmatmul.mubr.msk.f32.vlgmr.msra.gmra.mrb[2].mxu1 %vm142_vm5, %v59_v7  ;;  %v403_v34 = vld [vmem:[%s861_s7] sm:$0x3] }
  0x30   :  { %566 = vmatprep.mubr.msk.f32.mxu1 %vm681_vm0, %v680_v0  ;;  %578 = vmatpush3.bf16.msra.mxu0 %v577_v36 }
  0x31   :  { %579 = vmatprep.subr.bf16.mxu0 %v682_v1 }
  0x34   :  { %581 = vmatpush3.bf16.msra.mxu0 %v580_v39 }
  0x35   :  { %582 = vmatprep.subr.bf16.mxu0 %v682_v1 }
  0x38   :  { %584 = vmatpush3.bf16.msra.mxu0 %v583_v42 }
  0xfd   :  { %v138_v9 = vpop.f32.mrb[0].mxu1 }
  0xfe   :  { %v537_v10 = vpop.f32.mrb[1].mxu1 }
 0x102   :  { %v215_v12 = vpop.f32.mrb[2].mxu1 }
 0x103   :  { %v216_v14 = vadd.f32 %v215_v12, %v138_v9  ;;  %v544_v15 = vpop.f32.mrb[3].mxu1 }
 0x104   :  { %v404_v15 = vld [vmem:[%s862_s8] sm:$0x3] }
 0x105   :  { %v224_v16 = vadd.f32 %v508_v13, %v216_v14 }
 0x107   :  { %v230_v17 = vsel %vm227_vm6, %v224_v16, 0.0  ;;  %v235_v19 = vsel %vm231_vm7, %v224_v16, 0.0 }
 0x108   :  { %v232_v18 = vsel %vm231_vm7, %v230_v17, 0.0 }
 0x109   :  { %233 = vadd.xlane.f32.xlu0 %v232_v18 }
 0x10d   :  { %236 = vadd.xlane.f32.xlu0 %v235_v19 }
 0x196   :  { %v234_v20 = vpop.xlane.xlu0 %233 }
 0x197   :  { %v238_v23 = vmul.f32 0.03125, %v234_v20 }
 0x19a   :  { %v237_v21 = vpop.xlane.xlu0 %236 }
 0x19b   :  { %v239_v22 = vsub.f32 %v237_v21, %v234_v20 }
 0x19d   :  { %v240_v24 = vmul.f32 0.03125, %v239_v22 }
 0x19f   :  { %v241_v25 = vsel %vm227_vm6, %v238_v23, %v240_v24 }
 0x1a0   :  { %v242_v26 = vsub.f32 %v224_v16, %v241_v25  ;;  %v684_v16 = vmov 0  }
 0x1a1   :  { %595 = vset.pattern.permute.xlu0 %v684_v16 }
 0x1a2   :  { %v243_v27 = vmul.f32 %v242_v26, %v242_v26 }
 0x1a4   :  { %v244_v28 = vsel %vm227_vm6, %v243_v27, 0.0  ;;  %v248_v30 = vsel %vm231_vm7, %v243_v27, 0.0 }
 0x1a5   :  { %v245_v29 = vsel %vm231_vm7, %v244_v28, 0.0 }
 0x1a6   :  { %246 = vadd.xlane.f32.xlu1 %v245_v29  ;;  %v514_v29 = vld [vmem:[%s860_s6 + $0x2] ss:$0 sm:$0xff] }
 0x1aa   :  { %249 = vadd.xlane.f32.xlu1 %v248_v30 }
 0x233   :  { %v247_v43 = vpop.xlane.xlu1 %246 }
 0x234   :  { %v251_v44 = vmul.f32 0.03125, %v247_v43 }
 0x236   :  { %v254_v47 = vadd.f32 1e-05, %v251_v44 }
 0x237   :  { %v250_v45 = vpop.xlane.xlu1 %249 }
 0x238   :  { %v252_v46 = vsub.f32 %v250_v45, %v247_v43  ;;  %596 = vrsqrt.f32 %v254_v47 }
 0x23a   :  { %v253_v48 = vmul.f32 0.03125, %v252_v46 }
 0x23c   :  { %v256_v49 = vadd.f32 1e-05, %v253_v48 }
 0x23e   :  { %598 = vrsqrt.f32 %v256_v49 }
 0x242   :  { %v597_v50 = vpop.eup %596 }
 0x248   :  { %v599_v51 = vpop.eup %598 }
 0x249   :  { %v258_v53 = vsel %vm227_vm6, %v597_v50, %v599_v51 }
 0x24a   :  { %v259_v54 = vmul.f32 %v258_v53, %v242_v26  ;;  %v513_v26 = vld [vmem:[%s860_s6 + $0x1] ss:$0 sm:$0xff]  ;;  %s648_s6 = scalar_lea.vmem %s495_s10, 32 }
 0x24b   :  { %p649_p2 = scmp.ne.s32.totalorder %s495_s10, %s648_s6  ;;  %p654_p4 = scmp.lt.s32.totalorder %s648_s6, %s648_s6 }
 0x24c   :  { %v264_v56 = vmul.f32 %v509_v52, %v259_v54 }
 0x24d   :  { %p655_p5 = por %p654_p4, %p653_p3 }
 0x24e   :  { %v269_v57 = vadd.f32 %v510_v55, %v264_v56 }
 0x24f   :  { %p656_p6 = pnand %p655_p5, %p649_p2 }
 0x250   :  { %vm270_vm8 = vcmp.ge.f32.partialorder %v269_v57, 0.0  ;;  %v271_v58 = vmul.f32 0.01, %v269_v57 }
 0x252   :  { %v272_v59 = vsel %vm270_vm8, %v269_v57, %v271_v58 }
 0x253   :  { %562 = vmatmul.mubr.msk.f32.vlgmr.msra.gmra.mrb[0].mxu0 %vm231_vm7, %v272_v59 }
 0x326   :  { %v355_v61 = vpop.f32.mrb[0].mxu0 }
 0x327   :  { %v356_v62 = vadd.f32 %v511_v60, %v355_v61  ;;  %v563_v63 = vpop.f32.mrb[1].mxu0 }
 0x329   :  { %v365_v0 = vsel %vm231_vm7, %v356_v62, 0.0  ;;  %v361_v1 = vsel %vm227_vm6, %v356_v62, 0.0 }
 0x32a   :  { %366 = vadd.xlane.f32.xlu1 %v365_v0  ;;  %v362_v2 = vsel %vm231_vm7, %v361_v1, 0.0 }
 0x32b   :  { %363 = vadd.xlane.f32.xlu0 %v362_v2 }
 0x3b7   :  { %v367_v3 = vpop.xlane.xlu1 %366 }
 0x3b8   :  { %v364_v4 = vpop.xlane.xlu0 %363 }
 0x3b9   :  { %v369_v5 = vsub.f32 %v367_v3, %v364_v4  ;;  %v368_v6 = vmul.f32 0.03125, %v364_v4 }
 0x3bb   :  { %v370_v7 = vmul.f32 0.03125, %v369_v5 }
 0x3bd   :  { %v371_v8 = vsel %vm227_vm6, %v368_v6, %v370_v7 }
 0x3be   :  { %v372_v9 = vsub.f32 %v356_v62, %v371_v8 }
 0x3c0   :  { %v373_v10 = vmul.f32 %v372_v9, %v372_v9 }
 0x3c2   :  { %v378_v12 = vsel %vm231_vm7, %v373_v10, 0.0  ;;  %v374_v13 = vsel %vm227_vm6, %v373_v10, 0.0 }
 0x3c3   :  { %379 = vadd.xlane.f32.xlu1 %v378_v12  ;;  %v375_v14 = vsel %vm231_vm7, %v374_v13, 0.0 }
 0x3c4   :  { %376 = vadd.xlane.f32.xlu0 %v375_v14 }
 0x3da   :  { %407 = vperm.xlu0 %595, %v404_v15  }
 0x450   :  { %v380_v17 = vpop.xlane.xlu1 %379 }
 0x451   :  { %v377_v18 = vpop.xlane.xlu0 %376 }
 0x452   :  { %v381_v19 = vmul.f32 0.03125, %v377_v18  ;;  %v382_v20 = vsub.f32 %v380_v17, %v377_v18 }
 0x454   :  { %v383_v21 = vmul.f32 0.03125, %v382_v20  ;;  %v384_v22 = vadd.f32 1e-05, %v381_v19 }
 0x456   :  { %v386_v23 = vadd.f32 1e-05, %v383_v21  ;;  %600 = vrsqrt.f32 %v384_v22 }
 0x458   :  { %602 = vrsqrt.f32 %v386_v23 }
 0x459   :  { %v408_v11 = vpop.permute.xlu0 %407 }
 0x460   :  { %v601_v24 = vpop.eup %600 }
 0x462   :  { %v603_v25 = vpop.eup %602 }
 0x463   :  { %v388_v27 = vsel %vm227_vm6, %v601_v24, %v603_v25 }
 0x464   :  { %v389_v28 = vmul.f32 %v388_v27, %v372_v9 }
 0x466   :  { %v394_v30 = vmul.f32 %v513_v26, %v389_v28 }
 0x468   :  { %v399_v31 = vadd.f32 %v514_v29, %v394_v30 }
 0x46a   :  { %vm400_vm9 = vcmp.ge.f32.partialorder %v399_v31, 0.0  ;;  %v401_v32 = vmul.f32 0.01, %v399_v31 }
 0x46c   :  { %v402_v33 = vsel %vm400_vm9, %v399_v31, %v401_v32 }
 0x46d   :  { %565 = vmatpush3.xpose.msk.msra.mxu1 %vm231_vm7, %v402_v33 }
 0x470   :  { %567 = vmatmul.mubr.msk.f32.vlgmr.msra.gmra.mrb[4].mxu1 %vm231_vm7, %v403_v34 }
 0x543   :  { %v482_v35 = vpop.f32.mrb[4].mxu1 }
 0x544   :  { %v483_v36 = vadd.f32 %v482_v35, %v408_v11  ;;  %v568_v37 = vpop.f32.mrb[5].mxu1 }
 0x546   :  { %487 = vst.msk [vmem:[#allocation7] sm:$0x3] %vm486_vm10, %v483_v36 }
 0x547   :  { %659 = shalt.err (!%p656_p6)
}
 0x548   :  { %s660_s13 = scalar_lea.hbm %s863_s9, 32 }
 0x549   :  { %p661_p7 = scmp.ne.s32.totalorder %s863_s9, %s660_s13  ;;  %p664_p8 = scmp.lt.u32.totalorder %s660_s13, %s863_s9 }
 0x54b   :  { %p666_p9 = pnand %p664_p8, %p661_p7 }
 0x54d   :  { %669 = shalt.err (!%p666_p9)
}
 0x54e   :  { %497 = dma.vmem_to_hbm [thread:$0]  %s495_s10, 32, %s863_s9, [#allocation4]  }
 0x54f   :  { %674 = dma.done.wait [#allocation4], 32  }
 0x550   :  { %675 = vsyncadd [#allocation4], 4294967264 }
 0x551   :  { %501 = vsyncpa [#allocation3], 1 }
 0x552   :  { %502 = vsyncpa [#allocation6], 1 }
 0x553   :  { %503 = vsyncpa [#allocation4], 1 }

</bundles_post_ra>
